<compile_context>
chip_gen: v6e
topology: v6e:2x2x1
jax: 0.10.0
libtpu: 0.0.40
codegen_flags: <defaults>
</compile_context>

<pallas_src>
import jax
import jax.numpy as jnp
from jax import lax
from jax.experimental import pallas as pl
from jax.experimental.pallas import tpu as pltpu  # noqa: F401  (TPU backend)

VOCAB = 128
EMB = 32
HIDDEN = 32
BATCH = 2
SEQ = 8
NUM_CLASSES = 3
# TODO(synk): nn.Dropout(0.7) is identity in eval mode; no dropout is applied here.


def _bilstm_glove_kernel(ids_ref, emb_ref, w_ih_ref, w_hh_ref, b_ref,
                         w_lin_ref, b_lin_ref, out_ref):
    TB = ids_ref.shape[0]
    V = emb_ref.shape[0]
    H = w_hh_ref.shape[0]
    B = out_ref.shape[0]
    T = TB // B

    # --- fused embedding lookup: one-hot matmul on the MXU -------------------
    # ids_ref is time-major flattened: row r = t*B + b.
    ids = ids_ref[...]                                                # (T*B, 1) i32
    onehot = (ids == lax.broadcasted_iota(jnp.int32, (TB, V), 1)
              ).astype(jnp.float32)                                   # (T*B, V)
    x_tm = jnp.dot(onehot, emb_ref[...],
                   preferred_element_type=jnp.float32)                # (T*B, E)

    # --- input projection hoisted out of the serial recurrence ---------------
    xproj = jnp.dot(x_tm, w_ih_ref[...],
                    preferred_element_type=jnp.float32) + b_ref[...]  # (T*B, 4H)

    # --- reverse-direction LSTM recurrence (this is ht[-1]) ------------------
    w_hh = w_hh_ref[...]                      # loop-invariant, loaded once
    h = jnp.zeros((B, H), jnp.float32)        # carried in vregs, not VMEM
    c = jnp.zeros((B, H), jnp.float32)

    # T is small and static -> fully unrolled; the scheduler can interleave the
    # MXU push, EUP sigmoid/tanh and VPU work of adjacent steps.
    for i in range(T):
        t = T - 1 - i                         # reverse direction: T-1, ..., 0
        g = xproj[t * B:(t + 1) * B, :] + jnp.dot(
            h, w_hh, preferred_element_type=jnp.float32)              # (B, 4H)
        ig = jax.nn.sigmoid(g[:, 0 * H:1 * H])                        # PyTorch gate
        fg = jax.nn.sigmoid(g[:, 1 * H:2 * H])                        # order i,f,g,o
        gg = jnp.tanh(g[:, 2 * H:3 * H])
        og = jax.nn.sigmoid(g[:, 3 * H:4 * H])
        c = fg * c + ig * gg
        h = og * jnp.tanh(c)

    # --- classifier head: Linear(H, 3) ---------------------------------------
    out_ref[...] = (jnp.dot(h, w_lin_ref[...],
                            preferred_element_type=jnp.float32) + b_lin_ref[...])


def bilstm_glove_forward(x_ids, lengths, params):
    """Forward pass of BiLstmGloveVector.

    `lengths` (the module's `l` argument) is accepted for signature parity but
    — exactly like the PyTorch forward — never used: the LSTM runs over the
    full padded sequence.
    """
    del lengths  # unused by BiLstmGloveVector.forward
    B, T = x_ids.shape
    V, E = params["embedding"].shape
    H = params["w_hh"].shape[0]

    # Tiny metadata-only prep on the int ids: time-major flatten (row = t*B+b).
    ids_tm = jnp.transpose(x_ids).reshape(T * B, 1).astype(jnp.int32)

    return pl.pallas_call(
        _bilstm_glove_kernel,
        out_shape=jax.ShapeDtypeStruct((B, NUM_CLASSES), jnp.float32),
        grid=(1,),
        in_specs=[
            pl.BlockSpec((T * B, 1), lambda i: (0, 0)),
            pl.BlockSpec((V, E), lambda i: (0, 0)),
            pl.BlockSpec((E, 4 * H), lambda i: (0, 0)),
            pl.BlockSpec((H, 4 * H), lambda i: (0, 0)),
            pl.BlockSpec((1, 4 * H), lambda i: (0, 0)),
            pl.BlockSpec((H, NUM_CLASSES), lambda i: (0, 0)),
            pl.BlockSpec((1, NUM_CLASSES), lambda i: (0, 0)),
        ],
        out_specs=pl.BlockSpec((B, NUM_CLASSES), lambda i: (0, 0)),
    )(ids_tm, params["embedding"], params["w_ih"], params["w_hh"], params["b"],
      params["w_lin"], params["b_lin"])


def reference_forward(x_ids, params):
    """Pure-JAX reference of the same semantics (silent correctness check)."""
    emb = params["embedding"][x_ids]               # (B, T, E)
    B, T, _ = emb.shape
    H = params["w_hh"].shape[0]
    h = jnp.zeros((B, H), jnp.float32)
    c = jnp.zeros((B, H), jnp.float32)
    for t in range(T - 1, -1, -1):                 # reverse direction
        x_t = emb[:, t, :]
        g = x_t @ params["w_ih"] + h @ params["w_hh"] + params["b"]
        ig = jax.nn.sigmoid(g[:, 0 * H:1 * H])
        fg = jax.nn.sigmoid(g[:, 1 * H:2 * H])
        gg = jnp.tanh(g[:, 2 * H:3 * H])
        og = jax.nn.sigmoid(g[:, 3 * H:4 * H])
        c = fg * c + ig * gg
        h = og * jnp.tanh(c)
    return h @ params["w_lin"] + params["b_lin"]


def make_params(key):
    kE, k1, k2, k3, k4, k5, k6 = jax.random.split(key, 7)
    scale = 1.0 / jnp.sqrt(HIDDEN)
    # Frozen "GloVe" table.  (padding_idx=0 only zeroes gradients; the
    # weight.data.copy_(glove) in __init__ overwrites row 0 with glove[0].)
    emb = jax.random.normal(kE, (VOCAB, EMB), jnp.float32) * 0.1
    # Reverse-direction LSTM params (PyTorch weight_ih_l0_reverse, ...),
    # stored pre-transposed as (in_features, 4H) for row-major MXU matmuls.
    w_ih = jax.random.uniform(k1, (EMB, 4 * HIDDEN), jnp.float32, -scale, scale)
    w_hh = jax.random.uniform(k2, (HIDDEN, 4 * HIDDEN), jnp.float32, -scale, scale)
    b_ih = jax.random.uniform(k3, (4 * HIDDEN,), jnp.float32, -scale, scale)
    b_hh = jax.random.uniform(k4, (4 * HIDDEN,), jnp.float32, -scale, scale)
    w_lin = jax.random.uniform(k5, (HIDDEN, NUM_CLASSES), jnp.float32, -scale, scale)
    b_lin = jax.random.uniform(k6, (NUM_CLASSES,), jnp.float32, -scale, scale)
    return {
        "embedding": emb,
        "w_ih": w_ih,
        "w_hh": w_hh,
        "b": (b_ih + b_hh).reshape(1, 4 * HIDDEN),
        "w_lin": w_lin,
        "b_lin": b_lin.reshape(1, NUM_CLASSES),
    }


if __name__ == "__main__":
    key = jax.random.PRNGKey(0)
    k_param, k_ids = jax.random.split(key)
    params = make_params(k_param)

    # token ids (B, T) and per-sequence lengths l (B,) — l is unused by the
    # module's forward, but the batch is padded with token 0 as usual.
    x_ids = jax.random.randint(k_ids, (BATCH, SEQ), 1, VOCAB, dtype=jnp.int32)
    lengths = jnp.array([SEQ, 5], dtype=jnp.int32)
    t_idx = jnp.arange(SEQ)[None, :]
    x_ids = jnp.where(t_idx < lengths[:, None], x_ids, 0)

    out = jax.block_until_ready(bilstm_glove_forward(x_ids, lengths, params))
    ref = reference_forward(x_ids, params)

    assert out.shape == (BATCH, NUM_CLASSES)
    assert jnp.allclose(out, ref, rtol=1e-4, atol=1e-5), (out, ref)

    print("KERNEL_OK")
</pallas_src>

<mosaic_0001>
module attributes {stable_mosaic.version = 11 : i64} {
  func.func @_bilstm_glove_kernel(%arg0: i32, %arg1: memref<16x1xi32, #tpu.memory_space<vmem>>, %arg2: memref<128x32xf32, #tpu.memory_space<vmem>>, %arg3: memref<32x128xf32, #tpu.memory_space<vmem>>, %arg4: memref<32x128xf32, #tpu.memory_space<vmem>>, %arg5: memref<1x128xf32, #tpu.memory_space<vmem>>, %arg6: memref<32x3xf32, #tpu.memory_space<vmem>>, %arg7: memref<1x3xf32, #tpu.memory_space<vmem>>, %arg8: memref<2x3xf32, #tpu.memory_space<vmem>>) attributes {dimension_semantics = [#tpu.dimension_semantics<arbitrary>], iteration_bounds = array<i64: 1>, scalar_prefetch = 0 : i64, scratch_operands = 0 : i64, tpu.core_type = #tpu.core_type<tc>, window_params = [{pipeline_mode = #tpu.pipeline_mode<synchronous>, transform_indices = @transform_0, window_bounds = array<i64: 16, 1>}, {pipeline_mode = #tpu.pipeline_mode<synchronous>, transform_indices = @transform_1, window_bounds = array<i64: 128, 32>}, {pipeline_mode = #tpu.pipeline_mode<synchronous>, transform_indices = @transform_2, window_bounds = array<i64: 32, 128>}, {pipeline_mode = #tpu.pipeline_mode<synchronous>, transform_indices = @transform_3, window_bounds = array<i64: 32, 128>}, {pipeline_mode = #tpu.pipeline_mode<synchronous>, transform_indices = @transform_4, window_bounds = array<i64: 1, 128>}, {pipeline_mode = #tpu.pipeline_mode<synchronous>, transform_indices = @transform_5, window_bounds = array<i64: 32, 3>}, {pipeline_mode = #tpu.pipeline_mode<synchronous>, transform_indices = @transform_6, window_bounds = array<i64: 1, 3>}, {pipeline_mode = #tpu.pipeline_mode<synchronous>, transform_indices = @transform_7, window_bounds = array<i64: 2, 3>}]} {
    %c0 = arith.constant 0 : index
    %c0_0 = arith.constant 0 : index
    %0 = vector.load %arg1[%c0, %c0_0] : memref<16x1xi32, #tpu.memory_space<vmem>>, vector<16x1xi32>
    %1 = tpu.iota {dimensions = array<i32: 1>} : vector<16x128xi32>
    %2 = vector.broadcast %0 : vector<16x1xi32> to vector<16x128xi32>
    %3 = arith.cmpi eq, %2, %1 : vector<16x128xi32>
    %4 = arith.extui %3 : vector<16x128xi1> to vector<16x128xi32>
    %5 = arith.sitofp %4 : vector<16x128xi32> to vector<16x128xf32>
    %c0_1 = arith.constant 0 : index
    %c0_2 = arith.constant 0 : index
    %6 = vector.load %arg2[%c0_1, %c0_2] : memref<128x32xf32, #tpu.memory_space<vmem>>, vector<128x32xf32>
    %cst = arith.constant dense<0.000000e+00> : vector<16x32xf32>
    %7 = tpu.matmul %5, %6, %cst {dimension_numbers = #tpu.dot_dimension_numbers<[1], [0], [0], [1], [0, 0, 1, 1], [], []>} : vector<16x128xf32>, vector<128x32xf32>, vector<16x32xf32> -> vector<16x32xf32>
    %c0_3 = arith.constant 0 : index
    %c0_4 = arith.constant 0 : index
    %8 = vector.load %arg3[%c0_3, %c0_4] : memref<32x128xf32, #tpu.memory_space<vmem>>, vector<32x128xf32>
    %cst_5 = arith.constant dense<0.000000e+00> : vector<16x128xf32>
    %9 = tpu.matmul %7, %8, %cst_5 {dimension_numbers = #tpu.dot_dimension_numbers<[1], [0], [0], [1], [0, 0, 1, 1], [], []>} : vector<16x32xf32>, vector<32x128xf32>, vector<16x128xf32> -> vector<16x128xf32>
    %c0_6 = arith.constant 0 : index
    %c0_7 = arith.constant 0 : index
    %10 = vector.load %arg5[%c0_6, %c0_7] : memref<1x128xf32, #tpu.memory_space<vmem>>, vector<1x128xf32>
    %11 = vector.broadcast %10 : vector<1x128xf32> to vector<16x128xf32>
    %12 = arith.addf %9, %11 : vector<16x128xf32>
    %c0_8 = arith.constant 0 : index
    %c0_9 = arith.constant 0 : index
    %13 = vector.load %arg4[%c0_8, %c0_9] : memref<32x128xf32, #tpu.memory_space<vmem>>, vector<32x128xf32>
    %cst_10 = arith.constant 0.000000e+00 : f32
    %14 = vector.broadcast %cst_10 : f32 to vector<2x32xf32>
    %cst_11 = arith.constant 0.000000e+00 : f32
    %15 = vector.broadcast %cst_11 : f32 to vector<2x32xf32>
    %16 = vector.extract_strided_slice %12 {offsets = [14, 0], sizes = [2, 128], strides = [1, 1]} : vector<16x128xf32> to vector<2x128xf32>
    %cst_12 = arith.constant dense<0.000000e+00> : vector<2x128xf32>
    %17 = tpu.matmul %14, %13, %cst_12 {dimension_numbers = #tpu.dot_dimension_numbers<[1], [0], [0], [1], [0, 0, 1, 1], [], []>} : vector<2x32xf32>, vector<32x128xf32>, vector<2x128xf32> -> vector<2x128xf32>
    %18 = arith.addf %16, %17 : vector<2x128xf32>
    %19 = vector.extract_strided_slice %18 {offsets = [0, 0], sizes = [2, 32], strides = [1, 1]} : vector<2x128xf32> to vector<2x32xf32>
    %20 = arith.negf %19 : vector<2x32xf32>
    %21 = math.exp %20 : vector<2x32xf32>
    %cst_13 = arith.constant 1.000000e+00 : f32
    %22 = vector.broadcast %cst_13 : f32 to vector<2x32xf32>
    %23 = arith.addf %22, %21 : vector<2x32xf32>
    %24 = arith.divf %22, %23 : vector<2x32xf32>
    %25 = vector.extract_strided_slice %18 {offsets = [0, 32], sizes = [2, 32], strides = [1, 1]} : vector<2x128xf32> to vector<2x32xf32>
    %26 = arith.negf %25 : vector<2x32xf32>
    %27 = math.exp %26 : vector<2x32xf32>
    %cst_14 = arith.constant 1.000000e+00 : f32
    %28 = vector.broadcast %cst_14 : f32 to vector<2x32xf32>
    %29 = arith.addf %28, %27 : vector<2x32xf32>
    %30 = arith.divf %28, %29 : vector<2x32xf32>
    %31 = vector.extract_strided_slice %18 {offsets = [0, 64], sizes = [2, 32], strides = [1, 1]} : vector<2x128xf32> to vector<2x32xf32>
    %32 = math.tanh %31 : vector<2x32xf32>
    %33 = vector.extract_strided_slice %18 {offsets = [0, 96], sizes = [2, 32], strides = [1, 1]} : vector<2x128xf32> to vector<2x32xf32>
    %34 = arith.negf %33 : vector<2x32xf32>
    %35 = math.exp %34 : vector<2x32xf32>
    %cst_15 = arith.constant 1.000000e+00 : f32
    %36 = vector.broadcast %cst_15 : f32 to vector<2x32xf32>
    %37 = arith.addf %36, %35 : vector<2x32xf32>
    %38 = arith.divf %36, %37 : vector<2x32xf32>
    %39 = arith.mulf %30, %15 : vector<2x32xf32>
    %40 = arith.mulf %24, %32 : vector<2x32xf32>
    %41 = arith.addf %39, %40 : vector<2x32xf32>
    %42 = math.tanh %41 : vector<2x32xf32>
    %43 = arith.mulf %38, %42 : vector<2x32xf32>
    %44 = vector.extract_strided_slice %12 {offsets = [12, 0], sizes = [2, 128], strides = [1, 1]} : vector<16x128xf32> to vector<2x128xf32>
    %cst_16 = arith.constant dense<0.000000e+00> : vector<2x128xf32>
    %45 = tpu.matmul %43, %13, %cst_16 {dimension_numbers = #tpu.dot_dimension_numbers<[1], [0], [0], [1], [0, 0, 1, 1], [], []>} : vector<2x32xf32>, vector<32x128xf32>, vector<2x128xf32> -> vector<2x128xf32>
    %46 = arith.addf %44, %45 : vector<2x128xf32>
    %47 = vector.extract_strided_slice %46 {offsets = [0, 0], sizes = [2, 32], strides = [1, 1]} : vector<2x128xf32> to vector<2x32xf32>
    %48 = arith.negf %47 : vector<2x32xf32>
    %49 = math.exp %48 : vector<2x32xf32>
    %cst_17 = arith.constant 1.000000e+00 : f32
    %50 = vector.broadcast %cst_17 : f32 to vector<2x32xf32>
    %51 = arith.addf %50, %49 : vector<2x32xf32>
    %52 = arith.divf %50, %51 : vector<2x32xf32>
    %53 = vector.extract_strided_slice %46 {offsets = [0, 32], sizes = [2, 32], strides = [1, 1]} : vector<2x128xf32> to vector<2x32xf32>
    %54 = arith.negf %53 : vector<2x32xf32>
    %55 = math.exp %54 : vector<2x32xf32>
    %cst_18 = arith.constant 1.000000e+00 : f32
    %56 = vector.broadcast %cst_18 : f32 to vector<2x32xf32>
    %57 = arith.addf %56, %55 : vector<2x32xf32>
    %58 = arith.divf %56, %57 : vector<2x32xf32>
    %59 = vector.extract_strided_slice %46 {offsets = [0, 64], sizes = [2, 32], strides = [1, 1]} : vector<2x128xf32> to vector<2x32xf32>
    %60 = math.tanh %59 : vector<2x32xf32>
    %61 = vector.extract_strided_slice %46 {offsets = [0, 96], sizes = [2, 32], strides = [1, 1]} : vector<2x128xf32> to vector<2x32xf32>
    %62 = arith.negf %61 : vector<2x32xf32>
    %63 = math.exp %62 : vector<2x32xf32>
    %cst_19 = arith.constant 1.000000e+00 : f32
    %64 = vector.broadcast %cst_19 : f32 to vector<2x32xf32>
    %65 = arith.addf %64, %63 : vector<2x32xf32>
    %66 = arith.divf %64, %65 : vector<2x32xf32>
    %67 = arith.mulf %58, %41 : vector<2x32xf32>
    %68 = arith.mulf %52, %60 : vector<2x32xf32>
    %69 = arith.addf %67, %68 : vector<2x32xf32>
    %70 = math.tanh %69 : vector<2x32xf32>
    %71 = arith.mulf %66, %70 : vector<2x32xf32>
    %72 = vector.extract_strided_slice %12 {offsets = [10, 0], sizes = [2, 128], strides = [1, 1]} : vector<16x128xf32> to vector<2x128xf32>
    %cst_20 = arith.constant dense<0.000000e+00> : vector<2x128xf32>
    %73 = tpu.matmul %71, %13, %cst_20 {dimension_numbers = #tpu.dot_dimension_numbers<[1], [0], [0], [1], [0, 0, 1, 1], [], []>} : vector<2x32xf32>, vector<32x128xf32>, vector<2x128xf32> -> vector<2x128xf32>
    %74 = arith.addf %72, %73 : vector<2x128xf32>
    %75 = vector.extract_strided_slice %74 {offsets = [0, 0], sizes = [2, 32], strides = [1, 1]} : vector<2x128xf32> to vector<2x32xf32>
    %76 = arith.negf %75 : vector<2x32xf32>
    %77 = math.exp %76 : vector<2x32xf32>
    %cst_21 = arith.constant 1.000000e+00 : f32
    %78 = vector.broadcast %cst_21 : f32 to vector<2x32xf32>
    %79 = arith.addf %78, %77 : vector<2x32xf32>
    %80 = arith.divf %78, %79 : vector<2x32xf32>
    %81 = vector.extract_strided_slice %74 {offsets = [0, 32], sizes = [2, 32], strides = [1, 1]} : vector<2x128xf32> to vector<2x32xf32>
    %82 = arith.negf %81 : vector<2x32xf32>
    %83 = math.exp %82 : vector<2x32xf32>
    %cst_22 = arith.constant 1.000000e+00 : f32
    %84 = vector.broadcast %cst_22 : f32 to vector<2x32xf32>
    %85 = arith.addf %84, %83 : vector<2x32xf32>
    %86 = arith.divf %84, %85 : vector<2x32xf32>
    %87 = vector.extract_strided_slice %74 {offsets = [0, 64], sizes = [2, 32], strides = [1, 1]} : vector<2x128xf32> to vector<2x32xf32>
    %88 = math.tanh %87 : vector<2x32xf32>
    %89 = vector.extract_strided_slice %74 {offsets = [0, 96], sizes = [2, 32], strides = [1, 1]} : vector<2x128xf32> to vector<2x32xf32>
    %90 = arith.negf %89 : vector<2x32xf32>
    %91 = math.exp %90 : vector<2x32xf32>
    %cst_23 = arith.constant 1.000000e+00 : f32
    %92 = vector.broadcast %cst_23 : f32 to vector<2x32xf32>
    %93 = arith.addf %92, %91 : vector<2x32xf32>
    %94 = arith.divf %92, %93 : vector<2x32xf32>
    %95 = arith.mulf %86, %69 : vector<2x32xf32>
    %96 = arith.mulf %80, %88 : vector<2x32xf32>
    %97 = arith.addf %95, %96 : vector<2x32xf32>
    %98 = math.tanh %97 : vector<2x32xf32>
    %99 = arith.mulf %94, %98 : vector<2x32xf32>
    %100 = vector.extract_strided_slice %12 {offsets = [8, 0], sizes = [2, 128], strides = [1, 1]} : vector<16x128xf32> to vector<2x128xf32>
    %cst_24 = arith.constant dense<0.000000e+00> : vector<2x128xf32>
    %101 = tpu.matmul %99, %13, %cst_24 {dimension_numbers = #tpu.dot_dimension_numbers<[1], [0], [0], [1], [0, 0, 1, 1], [], []>} : vector<2x32xf32>, vector<32x128xf32>, vector<2x128xf32> -> vector<2x128xf32>
    %102 = arith.addf %100, %101 : vector<2x128xf32>
    %103 = vector.extract_strided_slice %102 {offsets = [0, 0], sizes = [2, 32], strides = [1, 1]} : vector<2x128xf32> to vector<2x32xf32>
    %104 = arith.negf %103 : vector<2x32xf32>
    %105 = math.exp %104 : vector<2x32xf32>
    %cst_25 = arith.constant 1.000000e+00 : f32
    %106 = vector.broadcast %cst_25 : f32 to vector<2x32xf32>
    %107 = arith.addf %106, %105 : vector<2x32xf32>
    %108 = arith.divf %106, %107 : vector<2x32xf32>
    %109 = vector.extract_strided_slice %102 {offsets = [0, 32], sizes = [2, 32], strides = [1, 1]} : vector<2x128xf32> to vector<2x32xf32>
    %110 = arith.negf %109 : vector<2x32xf32>
    %111 = math.exp %110 : vector<2x32xf32>
    %cst_26 = arith.constant 1.000000e+00 : f32
    %112 = vector.broadcast %cst_26 : f32 to vector<2x32xf32>
    %113 = arith.addf %112, %111 : vector<2x32xf32>
    %114 = arith.divf %112, %113 : vector<2x32xf32>
    %115 = vector.extract_strided_slice %102 {offsets = [0, 64], sizes = [2, 32], strides = [1, 1]} : vector<2x128xf32> to vector<2x32xf32>
    %116 = math.tanh %115 : vector<2x32xf32>
    %117 = vector.extract_strided_slice %102 {offsets = [0, 96], sizes = [2, 32], strides = [1, 1]} : vector<2x128xf32> to vector<2x32xf32>
    %118 = arith.negf %117 : vector<2x32xf32>
    %119 = math.exp %118 : vector<2x32xf32>
    %cst_27 = arith.constant 1.000000e+00 : f32
    %120 = vector.broadcast %cst_27 : f32 to vector<2x32xf32>
    %121 = arith.addf %120, %119 : vector<2x32xf32>
    %122 = arith.divf %120, %121 : vector<2x32xf32>
    %123 = arith.mulf %114, %97 : vector<2x32xf32>
    %124 = arith.mulf %108, %116 : vector<2x32xf32>
    %125 = arith.addf %123, %124 : vector<2x32xf32>
    %126 = math.tanh %125 : vector<2x32xf32>
    %127 = arith.mulf %122, %126 : vector<2x32xf32>
    %128 = vector.extract_strided_slice %12 {offsets = [6, 0], sizes = [2, 128], strides = [1, 1]} : vector<16x128xf32> to vector<2x128xf32>
    %cst_28 = arith.constant dense<0.000000e+00> : vector<2x128xf32>
    %129 = tpu.matmul %127, %13, %cst_28 {dimension_numbers = #tpu.dot_dimension_numbers<[1], [0], [0], [1], [0, 0, 1, 1], [], []>} : vector<2x32xf32>, vector<32x128xf32>, vector<2x128xf32> -> vector<2x128xf32>
    %130 = arith.addf %128, %129 : vector<2x128xf32>
    %131 = vector.extract_strided_slice %130 {offsets = [0, 0], sizes = [2, 32], strides = [1, 1]} : vector<2x128xf32> to vector<2x32xf32>
    %132 = arith.negf %131 : vector<2x32xf32>
    %133 = math.exp %132 : vector<2x32xf32>
    %cst_29 = arith.constant 1.000000e+00 : f32
    %134 = vector.broadcast %cst_29 : f32 to vector<2x32xf32>
    %135 = arith.addf %134, %133 : vector<2x32xf32>
    %136 = arith.divf %134, %135 : vector<2x32xf32>
    %137 = vector.extract_strided_slice %130 {offsets = [0, 32], sizes = [2, 32], strides = [1, 1]} : vector<2x128xf32> to vector<2x32xf32>
    %138 = arith.negf %137 : vector<2x32xf32>
    %139 = math.exp %138 : vector<2x32xf32>
    %cst_30 = arith.constant 1.000000e+00 : f32
    %140 = vector.broadcast %cst_30 : f32 to vector<2x32xf32>
    %141 = arith.addf %140, %139 : vector<2x32xf32>
    %142 = arith.divf %140, %141 : vector<2x32xf32>
    %143 = vector.extract_strided_slice %130 {offsets = [0, 64], sizes = [2, 32], strides = [1, 1]} : vector<2x128xf32> to vector<2x32xf32>
    %144 = math.tanh %143 : vector<2x32xf32>
    %145 = vector.extract_strided_slice %130 {offsets = [0, 96], sizes = [2, 32], strides = [1, 1]} : vector<2x128xf32> to vector<2x32xf32>
    %146 = arith.negf %145 : vector<2x32xf32>
    %147 = math.exp %146 : vector<2x32xf32>
    %cst_31 = arith.constant 1.000000e+00 : f32
    %148 = vector.broadcast %cst_31 : f32 to vector<2x32xf32>
    %149 = arith.addf %148, %147 : vector<2x32xf32>
    %150 = arith.divf %148, %149 : vector<2x32xf32>
    %151 = arith.mulf %142, %125 : vector<2x32xf32>
    %152 = arith.mulf %136, %144 : vector<2x32xf32>
    %153 = arith.addf %151, %152 : vector<2x32xf32>
    %154 = math.tanh %153 : vector<2x32xf32>
    %155 = arith.mulf %150, %154 : vector<2x32xf32>
    %156 = vector.extract_strided_slice %12 {offsets = [4, 0], sizes = [2, 128], strides = [1, 1]} : vector<16x128xf32> to vector<2x128xf32>
    %cst_32 = arith.constant dense<0.000000e+00> : vector<2x128xf32>
    %157 = tpu.matmul %155, %13, %cst_32 {dimension_numbers = #tpu.dot_dimension_numbers<[1], [0], [0], [1], [0, 0, 1, 1], [], []>} : vector<2x32xf32>, vector<32x128xf32>, vector<2x128xf32> -> vector<2x128xf32>
    %158 = arith.addf %156, %157 : vector<2x128xf32>
    %159 = vector.extract_strided_slice %158 {offsets = [0, 0], sizes = [2, 32], strides = [1, 1]} : vector<2x128xf32> to vector<2x32xf32>
    %160 = arith.negf %159 : vector<2x32xf32>
    %161 = math.exp %160 : vector<2x32xf32>
    %cst_33 = arith.constant 1.000000e+00 : f32
    %162 = vector.broadcast %cst_33 : f32 to vector<2x32xf32>
    %163 = arith.addf %162, %161 : vector<2x32xf32>
    %164 = arith.divf %162, %163 : vector<2x32xf32>
    %165 = vector.extract_strided_slice %158 {offsets = [0, 32], sizes = [2, 32], strides = [1, 1]} : vector<2x128xf32> to vector<2x32xf32>
    %166 = arith.negf %165 : vector<2x32xf32>
    %167 = math.exp %166 : vector<2x32xf32>
    %cst_34 = arith.constant 1.000000e+00 : f32
    %168 = vector.broadcast %cst_34 : f32 to vector<2x32xf32>
    %169 = arith.addf %168, %167 : vector<2x32xf32>
    %170 = arith.divf %168, %169 : vector<2x32xf32>
    %171 = vector.extract_strided_slice %158 {offsets = [0, 64], sizes = [2, 32], strides = [1, 1]} : vector<2x128xf32> to vector<2x32xf32>
    %172 = math.tanh %171 : vector<2x32xf32>
    %173 = vector.extract_strided_slice %158 {offsets = [0, 96], sizes = [2, 32], strides = [1, 1]} : vector<2x128xf32> to vector<2x32xf32>
    %174 = arith.negf %173 : vector<2x32xf32>
    %175 = math.exp %174 : vector<2x32xf32>
    %cst_35 = arith.constant 1.000000e+00 : f32
    %176 = vector.broadcast %cst_35 : f32 to vector<2x32xf32>
    %177 = arith.addf %176, %175 : vector<2x32xf32>
    %178 = arith.divf %176, %177 : vector<2x32xf32>
    %179 = arith.mulf %170, %153 : vector<2x32xf32>
    %180 = arith.mulf %164, %172 : vector<2x32xf32>
    %181 = arith.addf %179, %180 : vector<2x32xf32>
    %182 = math.tanh %181 : vector<2x32xf32>
    %183 = arith.mulf %178, %182 : vector<2x32xf32>
    %184 = vector.extract_strided_slice %12 {offsets = [2, 0], sizes = [2, 128], strides = [1, 1]} : vector<16x128xf32> to vector<2x128xf32>
    %cst_36 = arith.constant dense<0.000000e+00> : vector<2x128xf32>
    %185 = tpu.matmul %183, %13, %cst_36 {dimension_numbers = #tpu.dot_dimension_numbers<[1], [0], [0], [1], [0, 0, 1, 1], [], []>} : vector<2x32xf32>, vector<32x128xf32>, vector<2x128xf32> -> vector<2x128xf32>
    %186 = arith.addf %184, %185 : vector<2x128xf32>
    %187 = vector.extract_strided_slice %186 {offsets = [0, 0], sizes = [2, 32], strides = [1, 1]} : vector<2x128xf32> to vector<2x32xf32>
    %188 = arith.negf %187 : vector<2x32xf32>
    %189 = math.exp %188 : vector<2x32xf32>
    %cst_37 = arith.constant 1.000000e+00 : f32
    %190 = vector.broadcast %cst_37 : f32 to vector<2x32xf32>
    %191 = arith.addf %190, %189 : vector<2x32xf32>
    %192 = arith.divf %190, %191 : vector<2x32xf32>
    %193 = vector.extract_strided_slice %186 {offsets = [0, 32], sizes = [2, 32], strides = [1, 1]} : vector<2x128xf32> to vector<2x32xf32>
    %194 = arith.negf %193 : vector<2x32xf32>
    %195 = math.exp %194 : vector<2x32xf32>
    %cst_38 = arith.constant 1.000000e+00 : f32
    %196 = vector.broadcast %cst_38 : f32 to vector<2x32xf32>
    %197 = arith.addf %196, %195 : vector<2x32xf32>
    %198 = arith.divf %196, %197 : vector<2x32xf32>
    %199 = vector.extract_strided_slice %186 {offsets = [0, 64], sizes = [2, 32], strides = [1, 1]} : vector<2x128xf32> to vector<2x32xf32>
    %200 = math.tanh %199 : vector<2x32xf32>
    %201 = vector.extract_strided_slice %186 {offsets = [0, 96], sizes = [2, 32], strides = [1, 1]} : vector<2x128xf32> to vector<2x32xf32>
    %202 = arith.negf %201 : vector<2x32xf32>
    %203 = math.exp %202 : vector<2x32xf32>
    %cst_39 = arith.constant 1.000000e+00 : f32
    %204 = vector.broadcast %cst_39 : f32 to vector<2x32xf32>
    %205 = arith.addf %204, %203 : vector<2x32xf32>
    %206 = arith.divf %204, %205 : vector<2x32xf32>
    %207 = arith.mulf %198, %181 : vector<2x32xf32>
    %208 = arith.mulf %192, %200 : vector<2x32xf32>
    %209 = arith.addf %207, %208 : vector<2x32xf32>
    %210 = math.tanh %209 : vector<2x32xf32>
    %211 = arith.mulf %206, %210 : vector<2x32xf32>
    %212 = vector.extract_strided_slice %12 {offsets = [0, 0], sizes = [2, 128], strides = [1, 1]} : vector<16x128xf32> to vector<2x128xf32>
    %cst_40 = arith.constant dense<0.000000e+00> : vector<2x128xf32>
    %213 = tpu.matmul %211, %13, %cst_40 {dimension_numbers = #tpu.dot_dimension_numbers<[1], [0], [0], [1], [0, 0, 1, 1], [], []>} : vector<2x32xf32>, vector<32x128xf32>, vector<2x128xf32> -> vector<2x128xf32>
    %214 = arith.addf %212, %213 : vector<2x128xf32>
    %215 = vector.extract_strided_slice %214 {offsets = [0, 0], sizes = [2, 32], strides = [1, 1]} : vector<2x128xf32> to vector<2x32xf32>
    %216 = arith.negf %215 : vector<2x32xf32>
    %217 = math.exp %216 : vector<2x32xf32>
    %cst_41 = arith.constant 1.000000e+00 : f32
    %218 = vector.broadcast %cst_41 : f32 to vector<2x32xf32>
    %219 = arith.addf %218, %217 : vector<2x32xf32>
    %220 = arith.divf %218, %219 : vector<2x32xf32>
    %221 = vector.extract_strided_slice %214 {offsets = [0, 32], sizes = [2, 32], strides = [1, 1]} : vector<2x128xf32> to vector<2x32xf32>
    %222 = arith.negf %221 : vector<2x32xf32>
    %223 = math.exp %222 : vector<2x32xf32>
    %cst_42 = arith.constant 1.000000e+00 : f32
    %224 = vector.broadcast %cst_42 : f32 to vector<2x32xf32>
    %225 = arith.addf %224, %223 : vector<2x32xf32>
    %226 = arith.divf %224, %225 : vector<2x32xf32>
    %227 = vector.extract_strided_slice %214 {offsets = [0, 64], sizes = [2, 32], strides = [1, 1]} : vector<2x128xf32> to vector<2x32xf32>
    %228 = math.tanh %227 : vector<2x32xf32>
    %229 = vector.extract_strided_slice %214 {offsets = [0, 96], sizes = [2, 32], strides = [1, 1]} : vector<2x128xf32> to vector<2x32xf32>
    %230 = arith.negf %229 : vector<2x32xf32>
    %231 = math.exp %230 : vector<2x32xf32>
    %cst_43 = arith.constant 1.000000e+00 : f32
    %232 = vector.broadcast %cst_43 : f32 to vector<2x32xf32>
    %233 = arith.addf %232, %231 : vector<2x32xf32>
    %234 = arith.divf %232, %233 : vector<2x32xf32>
    %235 = arith.mulf %226, %209 : vector<2x32xf32>
    %236 = arith.mulf %220, %228 : vector<2x32xf32>
    %237 = arith.addf %235, %236 : vector<2x32xf32>
    %238 = math.tanh %237 : vector<2x32xf32>
    %239 = arith.mulf %234, %238 : vector<2x32xf32>
    %c0_44 = arith.constant 0 : index
    %c0_45 = arith.constant 0 : index
    %240 = vector.load %arg6[%c0_44, %c0_45] : memref<32x3xf32, #tpu.memory_space<vmem>>, vector<32x3xf32>
    %cst_46 = arith.constant dense<0.000000e+00> : vector<2x3xf32>
    %241 = tpu.matmul %239, %240, %cst_46 {dimension_numbers = #tpu.dot_dimension_numbers<[1], [0], [0], [1], [0, 0, 1, 1], [], []>} : vector<2x32xf32>, vector<32x3xf32>, vector<2x3xf32> -> vector<2x3xf32>
    %c0_47 = arith.constant 0 : index
    %c0_48 = arith.constant 0 : index
    %242 = vector.load %arg7[%c0_47, %c0_48] : memref<1x3xf32, #tpu.memory_space<vmem>>, vector<1x3xf32>
    %243 = vector.broadcast %242 : vector<1x3xf32> to vector<2x3xf32>
    %244 = arith.addf %241, %243 : vector<2x3xf32>
    %c0_49 = arith.constant 0 : index
    %c0_50 = arith.constant 0 : index
    %245 = vector.load %arg8[%c0_49, %c0_50] : memref<2x3xf32, #tpu.memory_space<vmem>>, vector<2x3xf32>
    tpu.vector_store %arg8[%c0_49, %c0_50], %244 {strides = array<i32>} : memref<2x3xf32, #tpu.memory_space<vmem>>, vector<2x3xf32>,
    return
  }
  func.func @transform_0(%arg0: i32) -> (i32, i32) {
    %c0_i32 = arith.constant 0 : i32
    %c0_i32_0 = arith.constant 0 : i32
    %c0_i32_1 = arith.constant 0 : i32
    return %c0_i32, %c0_i32_0 : i32, i32
  }
  func.func @transform_1(%arg0: i32) -> (i32, i32) {
    %c0_i32 = arith.constant 0 : i32
    %c0_i32_0 = arith.constant 0 : i32
    %c0_i32_1 = arith.constant 0 : i32
    return %c0_i32, %c0_i32_0 : i32, i32
  }
  func.func @transform_2(%arg0: i32) -> (i32, i32) {
    %c0_i32 = arith.constant 0 : i32
    %c0_i32_0 = arith.constant 0 : i32
    %c0_i32_1 = arith.constant 0 : i32
    return %c0_i32, %c0_i32_0 : i32, i32
  }
  func.func @transform_3(%arg0: i32) -> (i32, i32) {
    %c0_i32 = arith.constant 0 : i32
    %c0_i32_0 = arith.constant 0 : i32
    %c0_i32_1 = arith.constant 0 : i32
    return %c0_i32, %c0_i32_0 : i32, i32
  }
  func.func @transform_4(%arg0: i32) -> (i32, i32) {
    %c0_i32 = arith.constant 0 : i32
    %c0_i32_0 = arith.constant 0 : i32
    %c0_i32_1 = arith.constant 0 : i32
    return %c0_i32, %c0_i32_0 : i32, i32
  }
  func.func @transform_5(%arg0: i32) -> (i32, i32) {
    %c0_i32 = arith.constant 0 : i32
    %c0_i32_0 = arith.constant 0 : i32
    %c0_i32_1 = arith.constant 0 : i32
    return %c0_i32, %c0_i32_0 : i32, i32
  }
  func.func @transform_6(%arg0: i32) -> (i32, i32) {
    %c0_i32 = arith.constant 0 : i32
    %c0_i32_0 = arith.constant 0 : i32
    %c0_i32_1 = arith.constant 0 : i32
    return %c0_i32, %c0_i32_0 : i32, i32
  }
  func.func @transform_7(%arg0: i32) -> (i32, i32) {
    %c0_i32 = arith.constant 0 : i32
    %c0_i32_0 = arith.constant 0 : i32
    %c0_i32_1 = arith.constant 0 : i32
    return %c0_i32, %c0_i32_0 : i32, i32
  }
}

</mosaic_0001>

<bundles_post_ra>
// kernel: tpu_custom_call.1
= control target key start
LH: loop header
LB: loop body
LE: loop exit
PB: predicated region body
PF: predicated region fallthrough
CT: control target
= control target key end

     0   :  { %v1508_v2 = vmov 0   ;;  %s1803_s0 = inlined_call_operand.vmem [shape: s32[16,1], index: 0, kind: input, shape index: {}]   ;;  %s1804_s1 = inlined_call_operand.vmem [shape: f32[128,32], index: 1, kind: input, shape index: {}]   ;;  %s1805_s2 = inlined_call_operand.vmem [shape: f32[32,128], index: 2, kind: input, shape index: {}]   ;;  %s1806_s3 = inlined_call_operand.vmem [shape: f32[32,128], index: 3, kind: input, shape index: {}]   ;;  %s1807_s4 = inlined_call_operand.vmem [shape: f32[1,128], index: 4, kind: input, shape index: {}]   ;;  %s1808_s5 = inlined_call_operand.vmem [shape: f32[32,3], index: 5, kind: input, shape index: {}]   ;;  %s1809_s6 = inlined_call_operand.vmem [shape: f32[1,3], index: 6, kind: input, shape index: {}]   ;;  %s1810_s7 = inlined_call_operand.hbm [shape: f32[2,3], index: 7, kind: output, shape index: {}]  }
   0x1   :  { %v27_v0 = vld [vmem:[%s1803_s0] sm:$0xff]  ;;  %v58_v1 = vld [vmem:[%s1804_s1 + $0x78] sm:$0xff]  ;;  %1421 = vset.pattern.permute.xlu0 %v1508_v2  ;;  %v57_v3 = vld [vmem:[%s1804_s1 + $0x70] sm:$0xff] }
   0x2   :  { %1269 = vmatprep.subr.mxu0 %v58_v1  ;;  %32 = vperm.xlu0 %1421, %v27_v0   ;;  %v56_v4 = vld [vmem:[%s1804_s1 + $0x68] sm:$0xff]  ;;  %v55_v6 = vld [vmem:[%s1804_s1 + $0x60] sm:$0xff]  ;;  %v54_v7 = vld [vmem:[%s1804_s1 + $0x58] sm:$0xff] }
   0x3   :  { %1270 = vmatpush3.msra.mxu0 %v58_v1  ;;  %v28_v5 = vld [vmem:[%s1803_s0 + $0x8] sm:$0xff]  ;;  %v137_v8 = vld [vmem:[%s1805_s2 + $0x18] sm:$0xff]  ;;  %v136_v9 = vld [vmem:[%s1805_s2 + $0x10] sm:$0xff] }
   0x4   :  { %1271 = vmatprep.subr.mxu0 %v57_v3  ;;  %1304 = vmatprep.subr.mxu1 %v137_v8 }
   0x5   :  { %1272 = vmatpush3.msra.mxu0 %v57_v3 }
   0x6   :  { %1273 = vmatprep.subr.mxu0 %v56_v4  ;;  %35 = vperm.xlu0 %1421, %v28_v5  }
   0x7   :  { %1274 = vmatpush3.msra.mxu0 %v56_v4 }
   0x8   :  { %1275 = vmatprep.subr.mxu0 %v55_v6 }
   0x9   :  { %12 = vsyncpa [#allocation3], 0  ;;  %1276 = vmatpush3.msra.mxu0 %v55_v6  ;;  %v53_v10 = vld [vmem:[%s1804_s1 + $0x50] sm:$0xff]  ;;  %1305 = vmatpush3.msra.mxu1 %v137_v8  ;;  %v135_v11 = vld [vmem:[%s1805_s2 + $0x8] sm:$0xff]  ;;  %v29_v22 = vlaneseq  ;;  %v1509_v25 = vmov 1.0   ;;  %v1510_v28 = vmov 0.0  }
   0xa   :  { %1277 = vmatprep.subr.mxu0 %v54_v7  ;;  %1306 = vmatprep.subr.mxu1 %v136_v9  ;;  %v52_v12 = vld [vmem:[%s1804_s1 + $0x48] sm:$0xff]  ;;  %v51_v13 = vld [vmem:[%s1804_s1 + $0x40] sm:$0xff]  ;;  %v50_v14 = vld [vmem:[%s1804_s1 + $0x38] sm:$0xff]  ;;  %vm1511_vm2 = vmmov 0   ;;  %vm145_vm3 = vcmask 261120   ;;  %s1512_s27 = smov 64  }
   0xb   :  { %1278 = vmatpush3.msra.mxu0 %v54_v7  ;;  %1307 = vmatpush3.msra.mxu1 %v136_v9  ;;  %v49_v15 = vld [vmem:[%s1804_s1 + $0x30] sm:$0xff]  ;;  %v48_v16 = vld [vmem:[%s1804_s1 + $0x28] sm:$0xff]  ;;  %v47_v17 = vld [vmem:[%s1804_s1 + $0x20] sm:$0xff]  ;;  %v30_v23 = vand.u32 127, %v29_v22  ;;  %s1514_s15 = smov [#allocation2]   ;;  %vm1160_vm4 = vcmask 17408  }
   0xc   :  { %1279 = vmatprep.subr.mxu0 %v53_v10  ;;  %1308 = vmatprep.subr.mxu1 %v135_v11  ;;  %v46_v18 = vld [vmem:[%s1804_s1 + $0x18] sm:$0xff]  ;;  %v45_v19 = vld [vmem:[%s1804_s1 + $0x10] sm:$0xff]  ;;  %v44_v20 = vld [vmem:[%s1804_s1 + $0x8] sm:$0xff] }
   0xd   :  { %1280 = vmatpush3.msra.mxu0 %v53_v10  ;;  %1309 = vmatpush3.msra.mxu1 %v135_v11  ;;  %v43_v21 = vld [vmem:[%s1804_s1] sm:$0xff]  ;;  %v1625_v29 = vld [vmem:[%s1806_s3 + $0x18] sm:$0xff]  ;;  %v1633_v30 = vld [vmem:[%s1806_s3 + $0x10] sm:$0xff] }
   0xe   :  { %1281 = vmatprep.subr.mxu0 %v52_v12  ;;  %v134_v27 = vld [vmem:[%s1805_s2] sm:$0xff]  ;;  %v1639_v31 = vld [vmem:[%s1806_s3 + $0x8] sm:$0xff] }
   0xf   :  { %1282 = vmatpush3.msra.mxu0 %v52_v12  ;;  %1310 = vmatprep.subr.mxu1 %v134_v27  ;;  %v1646_v32 = vld [vmem:[%s1806_s3] sm:$0xff] }
  0x10   :  { %1283 = vmatprep.subr.mxu0 %v51_v13  ;;  %1311 = vmatpush3.msra.mxu1 %v134_v27  ;;  %v1180_v36 = vld [vmem:[%s1807_s4] ss:$0 sm:$0xff]  ;;  %s1513_s4 = smov 32  }
  0x11   :  { %1284 = vmatpush3.msra.mxu0 %v51_v13  ;;  %1315 = vmatprep.subr.mxu1 %v1510_v28 }
  0x12   :  { %1285 = vmatprep.subr.mxu0 %v50_v14 }
  0x13   :  { %1286 = vmatpush3.msra.mxu0 %v50_v14 }
  0x14   :  { %1287 = vmatprep.subr.mxu0 %v49_v15 }
  0x15   :  { %1288 = vmatpush3.msra.mxu0 %v49_v15 }
  0x16   :  { %1289 = vmatprep.subr.mxu0 %v48_v16 }
  0x17   :  { %1290 = vmatpush3.msra.mxu0 %v48_v16 }
  0x18   :  { %1291 = vmatprep.subr.mxu0 %v47_v17 }
  0x19   :  { %1292 = vmatpush3.msra.mxu0 %v47_v17 }
  0x1a   :  { %1293 = vmatprep.subr.mxu0 %v46_v18 }
  0x1b   :  { %1294 = vmatpush3.msra.mxu0 %v46_v18 }
  0x1c   :  { %1295 = vmatprep.subr.mxu0 %v45_v19 }
  0x1d   :  { %1296 = vmatpush3.msra.mxu0 %v45_v19 }
  0x1e   :  { %1297 = vmatprep.subr.mxu0 %v44_v20 }
  0x1f   :  { %1298 = vmatpush3.msra.mxu0 %v44_v20 }
  0x20   :  { %1299 = vmatprep.subr.mxu0 %v43_v21 }
  0x21   :  { %1300 = vmatpush3.msra.mxu0 %v43_v21 }
  0x22   :  { %1348 = vmatprep.subr.mxu0 %v1510_v28 }
  0x7d   :  { %v33_v24 = vpop.permute.xlu0 %32 }
  0x7e   :  { %vm37_vm0 = vcmp.eq.s32.totalorder %v33_v24, %v30_v23 }
  0x7f   :  { %1301 = vmatprep.mubr.msk.f32.mxu0 %vm37_vm0, %v1509_v25 }
  0x81   :  { %v36_v26 = vpop.permute.xlu0 %35 }
  0x82   :  { %vm38_vm1 = vcmp.eq.s32.totalorder %v36_v26, %v30_v23 }
  0x83   :  { %1302 = vmatmul.mubr.msk.f32.vlgmr.msra.gmra.mxu0 %vm38_vm1, %v1509_v25 }
  0x84   :  { %1349 = vmatpush3.msra.mxu0 %v1625_v29  ;;  %1356 = vmatprep.mubr.msk.f32.mxu0 %vm1511_vm2, %v1510_v28 }
  0x85   :  { %1350 = vmatprep.subr.mxu0 %v1510_v28 }
  0x86   :  { %1351 = vmatpush3.msra.mxu0 %v1633_v30 }
  0x87   :  { %1352 = vmatprep.subr.mxu0 %v1510_v28 }
  0x88   :  { %1353 = vmatpush3.msra.mxu0 %v1639_v31 }
  0x89   :  { %1354 = vmatprep.subr.mxu0 %v1510_v28 }
  0x8a   :  { %1355 = vmatpush3.msra.mxu0 %v1646_v32 }
  0x8b   :  { %1370 = vmatprep.subr.mxu0 %v1510_v28 }
 0x143   :  { %v1303_v33 = vpop.f32.mrf.mxu0 }
 0x145   :  { %v125_v34 = vpop.f32.mrf.mxu0 }
 0x146   :  { %1312 = vmatprep.mubr.msk.f32.mxu1 %vm145_vm3, %v125_v34 }
 0x147   :  { %1313 = vmatmul.mubr.msk.f32.vlgmr.msra.gmra.mxu1 %vm145_vm3, %v1303_v33 }
 0x148   :  { %1316 = vmatpush3.msra.mxu1 %v1625_v29  ;;  %1323 = vmatprep.mubr.msk.f32.mxu1 %vm1511_vm2, %v1510_v28 }
 0x149   :  { %1317 = vmatprep.subr.mxu1 %v1510_v28 }
 0x14a   :  { %1318 = vmatpush3.msra.mxu1 %v1633_v30 }
 0x14b   :  { %1319 = vmatprep.subr.mxu1 %v1510_v28 }
 0x14c   :  { %1320 = vmatpush3.msra.mxu1 %v1639_v31 }
 0x14d   :  { %1321 = vmatprep.subr.mxu1 %v1510_v28 }
 0x14e   :  { %1322 = vmatpush3.msra.mxu1 %v1646_v32 }
 0x14f   :  { %1324 = vmatmul.mubr.f32.vlgmr.msra.gmra.mxu1 %v1510_v28  ;;  %1326 = vmatprep.subr.mxu1 %v1510_v28 }
 0x150   :  { %1327 = vmatpush3.msra.mxu1 %v1625_v29  ;;  %1334 = vmatprep.mubr.msk.f32.mxu1 %vm1511_vm2, %v1510_v28 }
 0x151   :  { %1328 = vmatprep.subr.mxu1 %v1510_v28 }
 0x152   :  { %1329 = vmatpush3.msra.mxu1 %v1633_v30 }
 0x153   :  { %1330 = vmatprep.subr.mxu1 %v1510_v28 }
 0x154   :  { %1331 = vmatpush3.msra.mxu1 %v1639_v31 }
 0x155   :  { %1332 = vmatprep.subr.mxu1 %v1510_v28 }
 0x156   :  { %1333 = vmatpush3.msra.mxu1 %v1646_v32 }
 0x157   :  { %1337 = vmatprep.subr.mxu1 %v1510_v28 }
 0x207   :  { %v1314_v35 = vpop.f32.mrf.mxu1 }
 0x208   :  { %v1681_v40 = vadd.f32 %v1314_v35, %v1180_v36 }
 0x209   :  { %v218_v37 = vpop.f32.mrf.mxu1 }
 0x20a   :  { %v1679_v38 = vadd.f32 %v1180_v36, %v218_v37 }
 0x20f   :  { %v300_v39 = vpop.f32.mrf.mxu1 }
 0x210   :  { %v305_v41 = vrot.slane %v300_v39, 2 }
 0x211   :  { %v1325_v42 = vpop.f32.mrf.mxu1 }
 0x212   :  { %v307_v43 = vadd.f32 %v305_v41, %v1681_v40 }
 0x214   :  { %1422 = vtanh.f32 %v307_v43  ;;  %v1183_v45 = vmul.f32 -1.442695, %v307_v43 }
 0x216   :  { %1424 = vpow2.f32 %v1183_v45 }
 0x221   :  { %v1423_v44 = vpop.eup %1422 }
 0x222   :  { %317 = vrot.lane.b32.xlu1 %v1423_v44, %s1512_s27 }
 0x223   :  { %v1425_v46 = vpop.eup %1424 }
 0x224   :  { %v311_v47 = vadd.f32 1.0, %v1425_v46 }
 0x226   :  { %1426 = vrcp.f32 %v311_v47 }
 0x233   :  { %v1427_v48 = vpop.eup %1426 }
 0x234   :  { %v315_v51 = vmul.f32 0.0, %v1427_v48 }
 0x294   :  { %v318_v49 = vpop.permute.xlu1 %317 }
 0x295   :  { %v320_v50 = vmul.f32 %v1427_v48, %v318_v49 }
 0x297   :  { %322 = vrot.lane.b32.xlu1 %v320_v50, %s1513_s4 }
 0x309   :  { %v323_v52 = vpop.permute.xlu1 %322 }
 0x30a   :  { %v325_v53 = vadd.f32 %v323_v52, %v315_v51 }
 0x30c   :  { %1428 = vtanh.f32 %v325_v53  ;;  %v420_v6 = vrot.slane %v325_v53, 2 }
 0x319   :  { %v1429_v54 = vpop.eup %1428 }
 0x31a   :  { %328 = vrot.lane.b32.xlu0 %v1429_v54, %s1512_s27 }
 0x38c   :  { %v329_v55 = vpop.permute.xlu0 %328 }
 0x38d   :  { %v331_v56 = vmul.f32 %v1427_v48, %v329_v55 }
 0x38f   :  { %v333_v57 = vrot.slane %v331_v56, 6 }
 0x391   :  { %334 = vrot.lane.b32.xlu1 %v333_v57, %s1513_s4 }
 0x403   :  { %v335_v58 = vpop.permute.xlu1 %334 }
 0x404   :  { %1335 = vmatmul.mubr.msk.f32.vlgmr.msra.gmra.mxu1 %vm145_vm3, %v335_v58 }
 0x405   :  { %1338 = vmatpush3.msra.mxu1 %v1625_v29  ;;  %1345 = vmatprep.mubr.msk.f32.mxu1 %vm1511_vm2, %v1510_v28 }
 0x406   :  { %1339 = vmatprep.subr.mxu1 %v1510_v28 }
 0x407   :  { %1340 = vmatpush3.msra.mxu1 %v1633_v30 }
 0x408   :  { %1341 = vmatprep.subr.mxu1 %v1510_v28 }
 0x409   :  { %1342 = vmatpush3.msra.mxu1 %v1639_v31 }
 0x40a   :  { %1343 = vmatprep.subr.mxu1 %v1510_v28 }
 0x40b   :  { %1344 = vmatpush3.msra.mxu1 %v1646_v32 }
 0x40c   :  { %1359 = vmatprep.subr.mxu1 %v1510_v28 }
 0x4c4   :  { %v404_v59 = vpop.f32.mrf.mxu1 }
 0x4c5   :  { %v409_v60 = vrot.slane %v404_v59, 4 }
 0x4c6   :  { %v1336_v61 = vpop.f32.mrf.mxu1 }
 0x4c7   :  { %v411_v62 = vadd.f32 %v409_v60, %v1681_v40 }
 0x4c9   :  { %1430 = vtanh.f32 %v411_v62  ;;  %v1185_v0 = vmul.f32 -1.442695, %v411_v62 }
 0x4cb   :  { %1432 = vpow2.f32 %v1185_v0 }
 0x4d6   :  { %v1431_v63 = vpop.eup %1430 }
 0x4d7   :  { %424 = vrot.lane.b32.xlu0 %v1431_v63, %s1512_s27 }
 0x4d8   :  { %v1433_v1 = vpop.eup %1432 }
 0x4d9   :  { %v415_v2 = vadd.f32 1.0, %v1433_v1 }
 0x4db   :  { %1434 = vrcp.f32 %v415_v2 }
 0x4e8   :  { %v1435_v3 = vpop.eup %1434 }
 0x4e9   :  { %v422_v7 = vmul.f32 %v1435_v3, %v420_v6 }
 0x549   :  { %v425_v4 = vpop.permute.xlu0 %424 }
 0x54a   :  { %v427_v5 = vmul.f32 %v1435_v3, %v425_v4 }
 0x54c   :  { %429 = vrot.lane.b32.xlu1 %v427_v5, %s1513_s4 }
 0x5be   :  { %v430_v8 = vpop.permute.xlu1 %429 }
 0x5bf   :  { %v432_v9 = vadd.f32 %v430_v8, %v422_v7 }
 0x5c1   :  { %1436 = vtanh.f32 %v432_v9  ;;  %v527_v26 = vrot.slane %v432_v9, 2 }
 0x5ce   :  { %v1437_v10 = vpop.eup %1436 }
 0x5cf   :  { %435 = vrot.lane.b32.xlu0 %v1437_v10, %s1512_s27 }
 0x641   :  { %v436_v11 = vpop.permute.xlu0 %435 }
 0x642   :  { %v438_v12 = vmul.f32 %v1435_v3, %v436_v11 }
 0x644   :  { %v440_v13 = vrot.slane %v438_v12, 4 }
 0x646   :  { %441 = vrot.lane.b32.xlu1 %v440_v13, %s1513_s4 }
 0x6b8   :  { %v442_v14 = vpop.permute.xlu1 %441 }
 0x6b9   :  { %1346 = vmatmul.mubr.msk.f32.vlgmr.msra.gmra.mxu1 %vm145_vm3, %v442_v14 }
 0x6ba   :  { %1360 = vmatpush3.msra.mxu1 %v1625_v29  ;;  %1367 = vmatprep.mubr.msk.f32.mxu1 %vm1511_vm2, %v1510_v28 }
 0x6bb   :  { %1361 = vmatprep.subr.mxu1 %v1510_v28 }
 0x6bc   :  { %1362 = vmatpush3.msra.mxu1 %v1633_v30 }
 0x6bd   :  { %1363 = vmatprep.subr.mxu1 %v1510_v28 }
 0x6be   :  { %1364 = vmatpush3.msra.mxu1 %v1639_v31 }
 0x6bf   :  { %1365 = vmatprep.subr.mxu1 %v1510_v28 }
 0x6c0   :  { %1366 = vmatpush3.msra.mxu1 %v1646_v32 }
 0x6c1   :  { %1381 = vmatprep.subr.mxu1 %v1510_v28 }
 0x779   :  { %v511_v15 = vpop.f32.mrf.mxu1 }
 0x77a   :  { %v516_v16 = vrot.slane %v511_v15, 6 }
 0x77b   :  { %v1347_v17 = vpop.f32.mrf.mxu1 }
 0x77c   :  { %v518_v18 = vadd.f32 %v516_v16, %v1681_v40 }
 0x77e   :  { %1438 = vtanh.f32 %v518_v18  ;;  %v1187_v20 = vmul.f32 -1.442695, %v518_v18 }
 0x780   :  { %1440 = vpow2.f32 %v1187_v20 }
 0x78b   :  { %v1439_v19 = vpop.eup %1438 }
 0x78c   :  { %531 = vrot.lane.b32.xlu0 %v1439_v19, %s1512_s27 }
 0x78d   :  { %v1441_v21 = vpop.eup %1440 }
 0x78e   :  { %v522_v22 = vadd.f32 1.0, %v1441_v21 }
 0x790   :  { %1442 = vrcp.f32 %v522_v22 }
 0x79d   :  { %v1443_v23 = vpop.eup %1442 }
 0x79e   :  { %v529_v27 = vmul.f32 %v1443_v23, %v527_v26 }
 0x7fe   :  { %v532_v24 = vpop.permute.xlu0 %531 }
 0x7ff   :  { %v534_v25 = vmul.f32 %v1443_v23, %v532_v24 }
 0x801   :  { %536 = vrot.lane.b32.xlu1 %v534_v25, %s1513_s4 }
 0x873   :  { %v537_v33 = vpop.permute.xlu1 %536 }
 0x874   :  { %v539_v34 = vadd.f32 %v537_v33, %v529_v27 }
 0x876   :  { %1444 = vtanh.f32 %v539_v34  ;;  %v631_v52 = vrot.slane %v539_v34, 2 }
 0x883   :  { %v1445_v35 = vpop.eup %1444 }
 0x884   :  { %542 = vrot.lane.b32.xlu0 %v1445_v35, %s1512_s27 }
 0x8f6   :  { %v543_v36 = vpop.permute.xlu0 %542 }
 0x8f7   :  { %v545_v37 = vmul.f32 %v1443_v23, %v543_v36 }
 0x8f9   :  { %v547_v39 = vrot.slane %v545_v37, 2 }
 0x8fb   :  { %548 = vrot.lane.b32.xlu1 %v547_v39, %s1513_s4 }
 0x96d   :  { %v549_v41 = vpop.permute.xlu1 %548 }
 0x96e   :  { %1357 = vmatmul.mubr.msk.f32.vlgmr.msra.gmra.mxu0 %vm145_vm3, %v549_v41 }
 0x96f   :  { %1371 = vmatpush3.msra.mxu0 %v1625_v29  ;;  %1378 = vmatprep.mubr.msk.f32.mxu0 %vm1511_vm2, %v1510_v28 }
 0x970   :  { %1372 = vmatprep.subr.mxu0 %v1510_v28 }
 0x971   :  { %1373 = vmatpush3.msra.mxu0 %v1633_v30 }
 0x972   :  { %1374 = vmatprep.subr.mxu0 %v1510_v28 }
 0x973   :  { %1375 = vmatpush3.msra.mxu0 %v1639_v31 }
 0x974   :  { %1376 = vmatprep.subr.mxu0 %v1510_v28 }
 0x975   :  { %1377 = vmatpush3.msra.mxu0 %v1646_v32 }
 0x976   :  { %1392 = vmatprep.subr.mxu0 %v1510_v28 }
 0xa2e   :  { %v618_v42 = vpop.f32.mrf.mxu0 }
 0xa2f   :  { %v622_v43 = vadd.f32 %v618_v42, %v1681_v40 }
 0xa30   :  { %v1358_v44 = vpop.f32.mrf.mxu0 }
 0xa31   :  { %1446 = vtanh.f32 %v622_v43  ;;  %v1189_v46 = vmul.f32 -1.442695, %v622_v43 }
 0xa33   :  { %1448 = vpow2.f32 %v1189_v46 }
 0xa3e   :  { %v1447_v45 = vpop.eup %1446 }
 0xa3f   :  { %635 = vrot.lane.b32.xlu0 %v1447_v45, %s1512_s27 }
 0xa40   :  { %v1449_v47 = vpop.eup %1448 }
 0xa41   :  { %v626_v48 = vadd.f32 1.0, %v1449_v47 }
 0xa43   :  { %1450 = vrcp.f32 %v626_v48 }
 0xa50   :  { %v1451_v49 = vpop.eup %1450 }
 0xa51   :  { %v633_v53 = vmul.f32 %v1451_v49, %v631_v52 }
 0xab1   :  { %v636_v50 = vpop.permute.xlu0 %635 }
 0xab2   :  { %v638_v51 = vmul.f32 %v1451_v49, %v636_v50 }
 0xab4   :  { %640 = vrot.lane.b32.xlu1 %v638_v51, %s1513_s4 }
 0xb26   :  { %v641_v54 = vpop.permute.xlu1 %640 }
 0xb27   :  { %v643_v55 = vadd.f32 %v641_v54, %v633_v53 }
 0xb29   :  { %1452 = vtanh.f32 %v643_v55  ;;  %v737_v6 = vrot.slane %v643_v55, 2 }
 0xb36   :  { %v1453_v40 = vpop.eup %1452 }
 0xb37   :  { %646 = vrot.lane.b32.xlu0 %v1453_v40, %s1512_s27 }
 0xba9   :  { %v647_v56 = vpop.permute.xlu0 %646 }
 0xbaa   :  { %v649_v57 = vmul.f32 %v1451_v49, %v647_v56 }
 0xbac   :  { %651 = vrot.lane.b32.xlu1 %v649_v57, %s1513_s4 }
 0xc1e   :  { %v652_v58 = vpop.permute.xlu1 %651 }
 0xc1f   :  { %1368 = vmatmul.mubr.msk.f32.vlgmr.msra.gmra.mxu1 %vm145_vm3, %v652_v58 }
 0xc20   :  { %1382 = vmatpush3.msra.mxu1 %v1625_v29  ;;  %1389 = vmatprep.mubr.msk.f32.mxu1 %vm1511_vm2, %v1510_v28 }
 0xc21   :  { %1383 = vmatprep.subr.mxu1 %v1510_v28 }
 0xc22   :  { %1384 = vmatpush3.msra.mxu1 %v1633_v30 }
 0xc23   :  { %1385 = vmatprep.subr.mxu1 %v1510_v28 }
 0xc24   :  { %1386 = vmatpush3.msra.mxu1 %v1639_v31 }
 0xc25   :  { %1387 = vmatprep.subr.mxu1 %v1510_v28 }
 0xc26   :  { %1388 = vmatpush3.msra.mxu1 %v1646_v32 }
 0xc27   :  { %1403 = vmatprep.subr.mxu1 %v1510_v28 }
 0xcdf   :  { %v721_v59 = vpop.f32.mrf.mxu1 }
 0xce0   :  { %v726_v60 = vrot.slane %v721_v59, 2 }
 0xce1   :  { %v1369_v61 = vpop.f32.mrf.mxu1 }
 0xce2   :  { %v728_v62 = vadd.f32 %v726_v60, %v1679_v38 }
 0xce4   :  { %1454 = vtanh.f32 %v728_v62  ;;  %v1191_v0 = vmul.f32 -1.442695, %v728_v62 }
 0xce6   :  { %1456 = vpow2.f32 %v1191_v0 }
 0xcf1   :  { %v1455_v63 = vpop.eup %1454 }
 0xcf2   :  { %741 = vrot.lane.b32.xlu0 %v1455_v63, %s1512_s27 }
 0xcf3   :  { %v1457_v1 = vpop.eup %1456 }
 0xcf4   :  { %v732_v2 = vadd.f32 1.0, %v1457_v1 }
 0xcf6   :  { %1458 = vrcp.f32 %v732_v2 }
 0xd03   :  { %v1459_v3 = vpop.eup %1458 }
 0xd04   :  { %v739_v7 = vmul.f32 %v1459_v3, %v737_v6 }
 0xd64   :  { %v742_v4 = vpop.permute.xlu0 %741 }
 0xd65   :  { %v744_v5 = vmul.f32 %v1459_v3, %v742_v4 }
 0xd67   :  { %746 = vrot.lane.b32.xlu1 %v744_v5, %s1513_s4 }
 0xdd9   :  { %v747_v8 = vpop.permute.xlu1 %746 }
 0xdda   :  { %v749_v9 = vadd.f32 %v747_v8, %v739_v7  ;;  %v1076_v7 = vld [vmem:[%s1808_s5 + $0x10] sm:$0xff]  ;;  %v1075_v8 = vld [vmem:[%s1808_s5 + $0x8] sm:$0xff] }
 0xddc   :  { %1460 = vtanh.f32 %v749_v9 }
 0xde9   :  { %v1461_v10 = vpop.eup %1460 }
 0xdea   :  { %752 = vrot.lane.b32.xlu0 %v1461_v10, %s1512_s27 }
 0xe5c   :  { %v753_v11 = vpop.permute.xlu0 %752 }
 0xe5d   :  { %v755_v12 = vmul.f32 %v1459_v3, %v753_v11 }
 0xe5f   :  { %v757_v13 = vrot.slane %v755_v12, 6 }
 0xe61   :  { %758 = vrot.lane.b32.xlu1 %v757_v13, %s1513_s4 }
 0xed3   :  { %v759_v14 = vpop.permute.xlu1 %758 }
 0xed4   :  { %1379 = vmatmul.mubr.msk.f32.vlgmr.msra.gmra.mxu0 %vm145_vm3, %v759_v14  ;;  %v1198_v14 = vld [vmem:[%s1809_s6] ss:$0 sm:$0xff] }
 0xed5   :  { %1393 = vmatpush3.msra.mxu0 %v1625_v29  ;;  %1400 = vmatprep.mubr.msk.f32.mxu0 %vm1511_vm2, %v1510_v28 }
 0xed6   :  { %1394 = vmatprep.subr.mxu0 %v1510_v28 }
 0xed7   :  { %1395 = vmatpush3.msra.mxu0 %v1633_v30 }
 0xed8   :  { %1396 = vmatprep.subr.mxu0 %v1510_v28 }
 0xed9   :  { %1397 = vmatpush3.msra.mxu0 %v1639_v31 }
 0xeda   :  { %1398 = vmatprep.subr.mxu0 %v1510_v28 }
 0xedb   :  { %1399 = vmatpush3.msra.mxu0 %v1646_v32  ;;  %v844_v32 = vrot.slane %v749_v9, 2  ;;  %v1074_v9 = vld [vmem:[%s1808_s5] sm:$0xff] }
 0xf94   :  { %v828_v15 = vpop.f32.mrf.mxu0 }
 0xf95   :  { %v833_v16 = vrot.slane %v828_v15, 4 }
 0xf96   :  { %v1380_v17 = vpop.f32.mrf.mxu0 }
 0xf97   :  { %v835_v29 = vadd.f32 %v833_v16, %v1679_v38 }
 0xf99   :  { %1462 = vtanh.f32 %v835_v29  ;;  %v1193_v19 = vmul.f32 -1.442695, %v835_v29 }
 0xf9b   :  { %1464 = vpow2.f32 %v1193_v19 }
 0xfa6   :  { %v1463_v18 = vpop.eup %1462 }
 0xfa7   :  { %848 = vrot.lane.b32.xlu0 %v1463_v18, %s1512_s27 }
 0xfa8   :  { %v1465_v30 = vpop.eup %1464 }
 0xfa9   :  { %v839_v20 = vadd.f32 1.0, %v1465_v30 }
 0xfab   :  { %1466 = vrcp.f32 %v839_v20 }
 0xfb8   :  { %v1467_v21 = vpop.eup %1466 }
 0xfb9   :  { %v846_v23 = vmul.f32 %v1467_v21, %v844_v32 }
0x1019   :  { %v849_v31 = vpop.permute.xlu0 %848 }
0x101a   :  { %v851_v22 = vmul.f32 %v1467_v21, %v849_v31 }
0x101c   :  { %853 = vrot.lane.b32.xlu1 %v851_v22, %s1513_s4 }
0x108e   :  { %v854_v24 = vpop.permute.xlu1 %853 }
0x108f   :  { %v856_v25 = vadd.f32 %v854_v24, %v846_v23 }
0x1091   :  { %1468 = vtanh.f32 %v856_v25  ;;  %v951_v49 = vrot.slane %v856_v25, 2 }
0x109e   :  { %v1469_v26 = vpop.eup %1468 }
0x109f   :  { %859 = vrot.lane.b32.xlu0 %v1469_v26, %s1512_s27 }
0x1111   :  { %v860_v27 = vpop.permute.xlu0 %859 }
0x1112   :  { %v862_v33 = vmul.f32 %v1467_v21, %v860_v27 }
0x1114   :  { %v864_v34 = vrot.slane %v862_v33, 4 }
0x1116   :  { %865 = vrot.lane.b32.xlu1 %v864_v34, %s1513_s4 }
0x1188   :  { %v866_v35 = vpop.permute.xlu1 %865 }
0x1189   :  { %1390 = vmatmul.mubr.msk.f32.vlgmr.msra.gmra.mxu1 %vm145_vm3, %v866_v35 }
0x118a   :  { %1411 = vmatprep.mubr.msk.f32.mxu1 %vm1511_vm2, %v1510_v28 }
0x1249   :  { %v935_v36 = vpop.f32.mrf.mxu1 }
0x124a   :  { %v940_v37 = vrot.slane %v935_v36, 6 }
0x124b   :  { %v1391_v39 = vpop.f32.mrf.mxu1 }
0x124c   :  { %v942_v41 = vadd.f32 %v940_v37, %v1679_v38 }
0x124e   :  { %1470 = vtanh.f32 %v942_v41  ;;  %v1195_v43 = vmul.f32 -1.442695, %v942_v41 }
0x1250   :  { %1472 = vpow2.f32 %v1195_v43 }
0x125b   :  { %v1471_v42 = vpop.eup %1470 }
0x125c   :  { %955 = vrot.lane.b32.xlu0 %v1471_v42, %s1512_s27 }
0x125d   :  { %v1473_v44 = vpop.eup %1472 }
0x125e   :  { %v946_v45 = vadd.f32 1.0, %v1473_v44 }
0x1260   :  { %1474 = vrcp.f32 %v946_v45 }
0x126d   :  { %v1475_v46 = vpop.eup %1474 }
0x126e   :  { %v953_v50 = vmul.f32 %v1475_v46, %v951_v49 }
0x12ce   :  { %v956_v47 = vpop.permute.xlu0 %955 }
0x12cf   :  { %v958_v48 = vmul.f32 %v1475_v46, %v956_v47 }
0x12d1   :  { %960 = vrot.lane.b32.xlu1 %v958_v48, %s1513_s4 }
0x1343   :  { %v961_v51 = vpop.permute.xlu1 %960 }
0x1344   :  { %v963_v52 = vadd.f32 %v961_v51, %v953_v50 }
0x1346   :  { %1476 = vtanh.f32 %v963_v52  ;;  %v1055_v3 = vrot.slane %v963_v52, 2 }
0x1353   :  { %v1477_v53 = vpop.eup %1476 }
0x1354   :  { %966 = vrot.lane.b32.xlu0 %v1477_v53, %s1512_s27 }
0x13c6   :  { %v967_v54 = vpop.permute.xlu0 %966 }
0x13c7   :  { %v969_v55 = vmul.f32 %v1475_v46, %v967_v54 }
0x13c9   :  { %v971_v40 = vrot.slane %v969_v55, 2 }
0x13cb   :  { %972 = vrot.lane.b32.xlu1 %v971_v40, %s1513_s4 }
0x143d   :  { %v973_v56 = vpop.permute.xlu1 %972 }
0x143e   :  { %1401 = vmatmul.mubr.msk.f32.vlgmr.msra.gmra.mxu0 %vm145_vm3, %v973_v56 }
0x14fe   :  { %v1042_v57 = vpop.f32.mrf.mxu0 }
0x14ff   :  { %v1046_v58 = vadd.f32 %v1042_v57, %v1679_v38  ;;  %v1077_v38 = vld [vmem:[%s1808_s5 + $0x18] sm:$0xff]  ;;  %s1168_s5 = sshll.u32 %s1514_s15, 4  ;;  %s1169_s5 = int_to_ptr.vmem [resolvable:$true] %s1168_s5 }
0x1500   :  { %v1402_v59 = vpop.f32.mrf.mxu0  ;;  %1404 = vmatpush3.msra.mxu1 %v1077_v38  ;;  %s1486_s16 = scalar_lea.vmem %s1169_s5, 32  ;;  %p1491_p1 = scmp.lt.s32.totalorder %s1169_s5, %s1169_s5 }
0x1501   :  { %1478 = vtanh.f32 %v1046_v58  ;;  %v1197_v61 = vmul.f32 -1.442695, %v1046_v58  ;;  %1405 = vmatprep.subr.mxu1 %v1510_v28  ;;  %p1487_p0 = scmp.ne.s32.totalorder %s1169_s5, %s1486_s16  ;;  %p1492_p2 = scmp.lt.s32.totalorder %s1486_s16, %s1486_s16 }
0x1502   :  { %1406 = vmatpush3.msra.mxu1 %v1076_v7 }
0x1503   :  { %1480 = vpow2.f32 %v1197_v61  ;;  %1407 = vmatprep.subr.mxu1 %v1510_v28  ;;  %p1493_p3 = por %p1492_p2, %p1491_p1 }
0x1504   :  { %1408 = vmatpush3.msra.mxu1 %v1075_v8 }
0x1505   :  { %1409 = vmatprep.subr.mxu1 %v1510_v28  ;;  %p1494_p4 = pnand %p1493_p3, %p1487_p0 }
0x1506   :  { %1410 = vmatpush3.msra.mxu1 %v1074_v9 }
0x150e   :  { %v1479_v60 = vpop.eup %1478 }
0x150f   :  { %1059 = vrot.lane.b32.xlu0 %v1479_v60, %s1512_s27 }
0x1510   :  { %v1481_v62 = vpop.eup %1480 }
0x1511   :  { %v1050_v63 = vadd.f32 1.0, %v1481_v62 }
0x1513   :  { %1482 = vrcp.f32 %v1050_v63 }
0x1520   :  { %v1483_v0 = vpop.eup %1482 }
0x1521   :  { %v1057_v4 = vmul.f32 %v1483_v0, %v1055_v3 }
0x1581   :  { %v1060_v1 = vpop.permute.xlu0 %1059 }
0x1582   :  { %v1062_v2 = vmul.f32 %v1483_v0, %v1060_v1 }
0x1584   :  { %1064 = vrot.lane.b32.xlu1 %v1062_v2, %s1513_s4 }
0x15f6   :  { %v1065_v5 = vpop.permute.xlu1 %1064 }
0x15f7   :  { %v1067_v6 = vadd.f32 %v1065_v5, %v1057_v4 }
0x15f9   :  { %1484 = vtanh.f32 %v1067_v6 }
0x1606   :  { %v1485_v10 = vpop.eup %1484 }
0x1607   :  { %1070 = vrot.lane.b32.xlu0 %v1485_v10, %s1512_s27 }
0x1679   :  { %v1071_v11 = vpop.permute.xlu0 %1070 }
0x167a   :  { %v1073_v12 = vmul.f32 %v1483_v0, %v1071_v11 }
0x167c   :  { %1086 = vrot.lane.b32.xlu1 %v1073_v12, %s1513_s4 }
0x16ee   :  { %v1087_v13 = vpop.permute.xlu1 %1086 }
0x16ef   :  { %1412 = vmatmul.mubr.msk.f32.vlgmr.msra.gmra.mxu1 %vm145_vm3, %v1087_v13 }
0x17af   :  { %v1156_v15 = vpop.f32.mrf.mxu1 }
0x17b0   :  { %v1157_v28 = vadd.f32 %v1198_v14, %v1156_v15 }
0x17b1   :  { %v1413_v16 = vpop.f32.mrf.mxu1 }
0x17b2   :  { %1161 = vst.msk [vmem:[#allocation2] sm:$0x3] %vm1160_vm4, %v1157_v28 }
0x17b3   :  { %1497 = shalt.err (!%p1494_p4)
}
0x17b4   :  { %1171 = dma.vmem_to_hbm [thread:$0]  %s1169_s5, 32, %s1810_s7, [#allocation3]  }
0x17b5   :  { %1506 = dma.done.wait [#allocation3], 32  }
0x17b6   :  { %1507 = vsyncadd [#allocation3], 4294967264 }
0x17b7   :  { %1175 = vsyncpa [#allocation3], 1 }

</bundles_post_ra>
